<compile_context>
chip_gen: v7x
topology: tpu7x:2x2x1
jax: 0.10.0
libtpu: 0.0.40
codegen_flags: <defaults>
</compile_context>

<pallas_src>
import jax
import jax.numpy as jnp
from jax.experimental import pallas as pl
from jax.experimental.pallas import tpu as pltpu

_SQRT_HALF = 0.7071067811865476


# ---------------------------------------------------------------------------
# Pallas kernel: classification head  (pooled -> dense -> gelu -> classifier)
# Grid: (C splits over TensorCores, K tiles of the 4H reduction axis).
# ---------------------------------------------------------------------------
def _head_kernel(x_ref, w1_ref, b1_ref, w2_ref, b2_ref, o_ref):
    # x:  [Bp, H]  bf16 (resident)    w1: [H, TN] bf16    b1: [1, TN] f32
    # w2: [TN, Lp] bf16               b2: [1, Lp] f32 (resident)
    # o:  [Bp, Lp] f32 partial for split c (leading split dim squeezed away)
    c = pl.program_id(0)
    k = pl.program_id(1)

    @pl.when(k == 0)
    def _():
        # Classifier bias is counted exactly once (only in split 0's partial).
        bias = jnp.where(c == 0, b2_ref[...], jnp.zeros_like(b2_ref[...]))
        o_ref[...] = jnp.broadcast_to(bias, o_ref.shape)

    # dense tile -> bias -> exact (erf-based) GELU, f32 on MXU/EUP
    h = jnp.dot(x_ref[...], w1_ref[...],
                preferred_element_type=jnp.float32) + b1_ref[...]
    h = 0.5 * h * (1.0 + jax.lax.erf(h * _SQRT_HALF))
    # dropout: identity in eval mode (p=0.1 at train time)

    # classifier: accumulate partial products directly into the resident output
    o_ref[...] += jnp.dot(h.astype(w2_ref.dtype), w2_ref[...],
                          preferred_element_type=jnp.float32)


def _round_up(x, m):
    return (x + m - 1) // m * m


def _vmem_capacity_bytes():
    try:
        return int(pltpu.get_tpu_info().vmem_capacity_bytes)
    except Exception:
        return 64 << 20  # conservative (v7x-sized) fallback


def _num_core_splits():
    # Split the reduction across TensorCores only where there are 2 TCs/chip.
    try:
        kind = jax.devices()[0].device_kind.lower()
        if "v7" in kind or "7x" in kind:
            return 2
    except Exception:
        pass
    return 1


def _pick_tile(h4, h, lp, bp, n_splits, vmem_budget):
    """Largest 256-aligned (or full-extent) 4H tile whose streams fit VMEM."""
    for tn in (4096, 2048, 1024, 512, 256, 128):
        if tn > h4 or h4 % tn:
            continue
        if (h4 // tn) % n_splits:
            continue
        stream = 2 * (h * tn * 2 + tn * 4 + tn * lp * 2)     # double-buffered tiles
        resident = bp * h * 2 + lp * 4 + 2 * bp * lp * 4     # x, b2, out block
        if stream + resident <= vmem_budget:
            return tn
    return h4  # tiny / odd-shape fallback: single full-extent block


def prepare_head_params(w_dense, b_dense, w_cls, b_cls):
    """Run ONCE (at param-init time), not per forward call: bf16 cast + lane
    padding of the head weights so the forward path streams them directly."""
    H, H4 = w_dense.shape
    L = w_cls.shape[1]
    Lp = max(128, _round_up(L, 128))
    w1 = w_dense.astype(jnp.bfloat16)                                    # [H, 4H]
    b1 = b_dense.reshape(1, H4).astype(jnp.float32)                      # [1, 4H]
    w2 = jnp.zeros((H4, Lp), jnp.bfloat16).at[:, :L].set(w_cls.astype(jnp.bfloat16))
    b2 = jnp.zeros((1, Lp), jnp.float32).at[:, :L].set(
        b_cls.reshape(1, L).astype(jnp.float32))
    return {"w1": w1, "b1": b1, "w2": w2, "b2": b2}


def bert_classification_head(pooled, head_params, num_labels):
    """pooled: [B, H] f32; head_params from prepare_head_params -> [B, L] f32."""
    w1, b1, w2, b2 = (head_params["w1"], head_params["b1"],
                      head_params["w2"], head_params["b2"])
    B, H = pooled.shape
    H4 = w1.shape[1]
    Lp = w2.shape[1]
    L = num_labels

    Bp = max(16, _round_up(B, 16))            # bf16 vreg packs (16, 128) sublanes
    vmem_cap = _vmem_capacity_bytes()
    C = _num_core_splits()
    TN = _pick_tile(H4, H, Lp, Bp, C, (vmem_cap * 3) // 4)
    KT = H4 // TN
    if KT % C:
        C = 1
    K_per = KT // C                           # reduction steps per core split

    # Per-call activation prep only (tiny): pad batch, cast to bf16.
    x = jnp.zeros((Bp, H), jnp.bfloat16).at[:B].set(pooled.astype(jnp.bfloat16))

    # VMEM budget derived from the actual tile sizes (portable v5e/v6e/v7x).
    stream_bytes = 2 * (H * TN * 2 + TN * 4 + TN * Lp * 2)
    resident_bytes = Bp * H * 2 + Lp * 4 + 2 * Bp * Lp * 4
    vmem_limit = min(max(stream_bytes + resident_bytes + (4 << 20), 32 << 20),
                     vmem_cap)

    cost = pl.CostEstimate(
        flops=2 * Bp * H * H4 + 2 * Bp * H4 * Lp,
        transcendentals=Bp * H4,  # erf
        bytes_accessed=(H * H4 + H4 * Lp) * 2 + H4 * 4 + Lp * 4
                       + Bp * H * 2 + C * Bp * Lp * 4,
    )

    partials = pl.pallas_call(
        _head_kernel,
        out_shape=jax.ShapeDtypeStruct((C, Bp, Lp), jnp.float32),
        grid_spec=pltpu.PrefetchScalarGridSpec(
            num_scalar_prefetch=0,
            grid=(C, K_per),
            in_specs=[
                pl.BlockSpec((Bp, H), lambda c, k: (0, 0)),            # x resident
                pl.BlockSpec((H, TN), lambda c, k: (0, c * K_per + k)),  # dense W tile
                pl.BlockSpec((1, TN), lambda c, k: (0, c * K_per + k)),  # dense bias
                pl.BlockSpec((TN, Lp), lambda c, k: (c * K_per + k, 0)),  # cls W tile
                pl.BlockSpec((1, Lp), lambda c, k: (0, 0)),            # cls bias
            ],
            out_specs=pl.BlockSpec((None, Bp, Lp), lambda c, k: (c, 0, 0)),
        ),
        compiler_params=pltpu.CompilerParams(
            dimension_semantics=("parallel", "arbitrary"),
            vmem_limit_bytes=int(vmem_limit),
        ),
        cost_estimate=cost,
    )(x, w1, b1, w2, b2)

    out = partials[0] if C == 1 else jnp.sum(partials, axis=0)
    return out[:B, :L]


# ---------------------------------------------------------------------------
# Deterministic stand-in for the BERT backbone's pooled output (plain JAX glue)
# TODO(synk): the full transformer backbone (`self.model`) is external to this
#             module and is not implemented here.
# ---------------------------------------------------------------------------
def stub_bert_pooled(input_ids, attention_mask, token_type_ids, params):
    emb = params["word_emb"][input_ids] + params["type_emb"][token_type_ids]  # [B,S,H]
    mask = attention_mask[..., None].astype(jnp.float32)                      # [B,S,1]
    summed = jnp.sum(emb * mask, axis=1)
    count = jnp.maximum(jnp.sum(mask, axis=1), 1.0)
    mean = summed / count                                                     # [B,H]
    return jnp.tanh(mean @ params["pool_w"] + params["pool_b"])               # [B,H]


def init_params(key, vocab_size, hidden_size, num_labels):
    ks = jax.random.split(key, 5)
    # BertClassification._init_weight(): normal(0, 0.02) weights, zero biases.
    w_dense = 0.02 * jax.random.normal(ks[0], (hidden_size, 4 * hidden_size), jnp.float32)
    b_dense = jnp.zeros((4 * hidden_size,), jnp.float32)
    w_cls = 0.02 * jax.random.normal(ks[1], (4 * hidden_size, num_labels), jnp.float32)
    b_cls = jnp.zeros((num_labels,), jnp.float32)
    backbone = {
        "word_emb": 0.02 * jax.random.normal(ks[2], (vocab_size, hidden_size), jnp.float32),
        "type_emb": 0.02 * jax.random.normal(ks[3], (2, hidden_size), jnp.float32),
        "pool_w": 0.02 * jax.random.normal(ks[4], (hidden_size, hidden_size), jnp.float32),
        "pool_b": jnp.zeros((hidden_size,), jnp.float32),
    }
    return w_dense, b_dense, w_cls, b_cls, backbone


def bert_classification_forward(input_ids, attention_mask, token_type_ids,
                                head_params, num_labels, backbone):
    pooled = stub_bert_pooled(input_ids, attention_mask, token_type_ids, backbone)
    return bert_classification_head(pooled, head_params, num_labels)


if __name__ == "__main__":
    B, S, H, L, V = 2, 8, 32, 4, 64  # batch, seq, hidden, num_labels, vocab

    key = jax.random.PRNGKey(0)
    k_ids, k_mask, k_type, k_params = jax.random.split(key, 4)

    input_ids = jax.random.randint(k_ids, (B, S), 0, V, dtype=jnp.int32)
    attention_mask = jnp.ones((B, S), dtype=jnp.int32)
    token_type_ids = jnp.zeros((B, S), dtype=jnp.int32)

    w_dense, b_dense, w_cls, b_cls, backbone = init_params(k_params, V, H, L)

    # Weight cast/pad happens ONCE here, not on the forward path.
    head_params = jax.block_until_ready(
        prepare_head_params(w_dense, b_dense, w_cls, b_cls))

    logits = bert_classification_forward(
        input_ids, attention_mask, token_type_ids, head_params, L, backbone)
    logits = jax.block_until_ready(logits)

    # sanity: compare against a plain-JAX f32 reference of the head (bf16-tolerant)
    pooled = stub_bert_pooled(input_ids, attention_mask, token_type_ids, backbone)
    href = pooled @ w_dense + b_dense
    href = 0.5 * href * (1.0 + jax.lax.erf(href * _SQRT_HALF))
    ref = href @ w_cls + b_cls
    assert logits.shape == (B, L) and logits.dtype == jnp.float32
    assert bool(jnp.all(jnp.isfinite(logits)))
    assert bool(jnp.allclose(logits, ref, atol=1e-2, rtol=1e-2))
    print("KERNEL_OK")
</pallas_src>

<mosaic_0001>
module attributes {stable_mosaic.version = 11 : i64} {
  func.func @_head_kernel(%arg0: i32, %arg1: i32, %arg2: memref<16x32xbf16, #tpu.memory_space<vmem>>, %arg3: memref<32x128xbf16, #tpu.memory_space<vmem>>, %arg4: memref<1x128xf32, #tpu.memory_space<vmem>>, %arg5: memref<128x128xbf16, #tpu.memory_space<vmem>>, %arg6: memref<1x128xf32, #tpu.memory_space<vmem>>, %arg7: memref<1x16x128xf32, #tpu.memory_space<vmem>>) attributes {dimension_semantics = [#tpu.dimension_semantics<parallel>, #tpu.dimension_semantics<arbitrary>], iteration_bounds = array<i64: 1, 1>, scalar_prefetch = 0 : i64, scratch_operands = 0 : i64, tpu.core_type = #tpu.core_type<tc>, window_params = [{pipeline_mode = #tpu.pipeline_mode<synchronous>, transform_indices = @transform_0, window_bounds = array<i64: 16, 32>}, {transform_indices = @transform_1, window_bounds = array<i64: 32, 128>}, {transform_indices = @transform_2, window_bounds = array<i64: 1, 128>}, {transform_indices = @transform_3, window_bounds = array<i64: 128, 128>}, {pipeline_mode = #tpu.pipeline_mode<synchronous>, transform_indices = @transform_4, window_bounds = array<i64: 1, 128>}, {transform_indices = @transform_5, window_bounds = array<i64: 1, 16, 128>}]} {
    %c0_i32 = arith.constant 0 : i32
    %0 = arith.cmpi eq, %arg1, %c0_i32 : i32
    %1 = arith.extui %0 : i1 to i32
    %c0_i32_0 = arith.constant 0 : i32
    %2 = arith.cmpi ne, %1, %c0_i32_0 : i32
    scf.if %2 {
      %c0_i32_18 = arith.constant 0 : i32
      %26 = arith.cmpi eq, %arg0, %c0_i32_18 : i32
      %c0_19 = arith.constant 0 : index
      %c0_20 = arith.constant 0 : index
      %27 = vector.load %arg6[%c0_19, %c0_20] : memref<1x128xf32, #tpu.memory_space<vmem>>, vector<1x128xf32>
      %cst_21 = arith.constant 0.000000e+00 : f32
      %28 = vector.broadcast %cst_21 : f32 to vector<1x128xf32>
      %29 = arith.select %26, %27, %28 : vector<1x128xf32>
      %30 = vector.shape_cast %29 : vector<1x128xf32> to vector<1x128xf32>
      %31 = vector.broadcast %30 : vector<1x128xf32> to vector<16x128xf32>
      %c0_22 = arith.constant 0 : index
      %c0_23 = arith.constant 0 : index
      %c0_24 = arith.constant 0 : index
      %32 = vector.load %arg7[%c0_22, %c0_23, %c0_24] : memref<1x16x128xf32, #tpu.memory_space<vmem>>, vector<1x16x128xf32>
      %33 = vector.shape_cast %32 : vector<1x16x128xf32> to vector<16x128xf32>
      %34 = vector.shape_cast %31 : vector<16x128xf32> to vector<1x16x128xf32>
      tpu.vector_store %arg7[%c0_22, %c0_23, %c0_24], %34 {strides = array<i32>} : memref<1x16x128xf32, #tpu.memory_space<vmem>>, vector<1x16x128xf32>,
    } else {
    }
    %c0 = arith.constant 0 : index
    %c0_1 = arith.constant 0 : index
    %3 = vector.load %arg2[%c0, %c0_1] : memref<16x32xbf16, #tpu.memory_space<vmem>>, vector<16x32xbf16>
    %c0_2 = arith.constant 0 : index
    %c0_3 = arith.constant 0 : index
    %4 = vector.load %arg3[%c0_2, %c0_3] : memref<32x128xbf16, #tpu.memory_space<vmem>>, vector<32x128xbf16>
    %cst = arith.constant dense<0.000000e+00> : vector<16x128xf32>
    %5 = tpu.matmul %3, %4, %cst {dimension_numbers = #tpu.dot_dimension_numbers<[1], [0], [0], [1], [0, 0, 1, 1], [], []>} : vector<16x32xbf16>, vector<32x128xbf16>, vector<16x128xf32> -> vector<16x128xf32>
    %c0_4 = arith.constant 0 : index
    %c0_5 = arith.constant 0 : index
    %6 = vector.load %arg4[%c0_4, %c0_5] : memref<1x128xf32, #tpu.memory_space<vmem>>, vector<1x128xf32>
    %7 = vector.broadcast %6 : vector<1x128xf32> to vector<16x128xf32>
    %8 = arith.addf %5, %7 : vector<16x128xf32>
    %cst_6 = arith.constant 5.000000e-01 : f32
    %9 = vector.broadcast %cst_6 : f32 to vector<16x128xf32>
    %10 = arith.mulf %9, %8 : vector<16x128xf32>
    %cst_7 = arith.constant 0.707106769 : f32
    %11 = vector.broadcast %cst_7 : f32 to vector<16x128xf32>
    %12 = arith.mulf %8, %11 : vector<16x128xf32>
    %13 = math.erf %12 : vector<16x128xf32>
    %cst_8 = arith.constant 1.000000e+00 : f32
    %14 = vector.broadcast %cst_8 : f32 to vector<16x128xf32>
    %15 = arith.addf %14, %13 : vector<16x128xf32>
    %16 = arith.mulf %10, %15 : vector<16x128xf32>
    %c0_9 = arith.constant 0 : index
    %c0_10 = arith.constant 0 : index
    %c0_11 = arith.constant 0 : index
    %17 = vector.load %arg7[%c0_9, %c0_10, %c0_11] : memref<1x16x128xf32, #tpu.memory_space<vmem>>, vector<1x16x128xf32>
    %18 = vector.shape_cast %17 : vector<1x16x128xf32> to vector<16x128xf32>
    %19 = arith.truncf %16 : vector<16x128xf32> to vector<16x128xbf16>
    %c0_12 = arith.constant 0 : index
    %c0_13 = arith.constant 0 : index
    %20 = vector.load %arg5[%c0_12, %c0_13] : memref<128x128xbf16, #tpu.memory_space<vmem>>, vector<128x128xbf16>
    %cst_14 = arith.constant dense<0.000000e+00> : vector<16x128xf32>
    %21 = tpu.matmul %19, %20, %cst_14 {dimension_numbers = #tpu.dot_dimension_numbers<[1], [0], [0], [1], [0, 0, 1, 1], [], []>} : vector<16x128xbf16>, vector<128x128xbf16>, vector<16x128xf32> -> vector<16x128xf32>
    %22 = arith.addf %18, %21 : vector<16x128xf32>
    %c0_15 = arith.constant 0 : index
    %c0_16 = arith.constant 0 : index
    %c0_17 = arith.constant 0 : index
    %23 = vector.load %arg7[%c0_15, %c0_16, %c0_17] : memref<1x16x128xf32, #tpu.memory_space<vmem>>, vector<1x16x128xf32>
    %24 = vector.shape_cast %23 : vector<1x16x128xf32> to vector<16x128xf32>
    %25 = vector.shape_cast %22 : vector<16x128xf32> to vector<1x16x128xf32>
    tpu.vector_store %arg7[%c0_15, %c0_16, %c0_17], %25 {strides = array<i32>} : memref<1x16x128xf32, #tpu.memory_space<vmem>>, vector<1x16x128xf32>,
    return
  }
  func.func @transform_0(%arg0: i32, %arg1: i32) -> (i32, i32) {
    %c0_i32 = arith.constant 0 : i32
    %c0_i32_0 = arith.constant 0 : i32
    %c0_i32_1 = arith.constant 0 : i32
    return %c0_i32, %c0_i32_0 : i32, i32
  }
  func.func @transform_1(%arg0: i32, %arg1: i32) -> (i32, i32) {
    %c1_i32 = arith.constant 1 : i32
    %0 = arith.muli %arg0, %c1_i32 : i32
    %1 = arith.addi %0, %arg1 : i32
    %c0_i32 = arith.constant 0 : i32
    %c0_i32_0 = arith.constant 0 : i32
    return %c0_i32, %1 : i32, i32
  }
  func.func @transform_2(%arg0: i32, %arg1: i32) -> (i32, i32) {
    %c1_i32 = arith.constant 1 : i32
    %0 = arith.muli %arg0, %c1_i32 : i32
    %1 = arith.addi %0, %arg1 : i32
    %c0_i32 = arith.constant 0 : i32
    %c0_i32_0 = arith.constant 0 : i32
    return %c0_i32, %1 : i32, i32
  }
  func.func @transform_3(%arg0: i32, %arg1: i32) -> (i32, i32) {
    %c1_i32 = arith.constant 1 : i32
    %0 = arith.muli %arg0, %c1_i32 : i32
    %1 = arith.addi %0, %arg1 : i32
    %c0_i32 = arith.constant 0 : i32
    %c0_i32_0 = arith.constant 0 : i32
    return %1, %c0_i32 : i32, i32
  }
  func.func @transform_4(%arg0: i32, %arg1: i32) -> (i32, i32) {
    %c0_i32 = arith.constant 0 : i32
    %c0_i32_0 = arith.constant 0 : i32
    %c0_i32_1 = arith.constant 0 : i32
    return %c0_i32, %c0_i32_0 : i32, i32
  }
  func.func @transform_5(%arg0: i32, %arg1: i32) -> (i32, i32, i32) {
    %c0_i32 = arith.constant 0 : i32
    %c0_i32_0 = arith.constant 0 : i32
    %c0_i32_1 = arith.constant 0 : i32
    return %arg0, %c0_i32, %c0_i32_0 : i32, i32, i32
  }
}

</mosaic_0001>

<bundles_post_ra>
// kernel: tpu_custom_call.1
= control target key start
LH: loop header
LB: loop body
LE: loop exit
PB: predicated region body
PF: predicated region fallthrough
CT: control target
= control target key end

     0   :  { %10 = vsyncpa [#allocation3], 0  ;;  %s606_s0 = inlined_call_operand.hbm [shape: bf16[16,32], index: 0, kind: input, shape index: {}]   ;;  %s607_s1 = inlined_call_operand.hbm [shape: bf16[32,128], index: 1, kind: input, shape index: {}]   ;;  %s608_s2 = inlined_call_operand.vmem [shape: f32[1,128], index: 2, kind: input, shape index: {}]   ;;  %s609_s3 = inlined_call_operand.hbm [shape: bf16[128,128], index: 3, kind: input, shape index: {}]   ;;  %s610_s4 = inlined_call_operand.vmem [shape: f32[1,128], index: 4, kind: input, shape index: {}]   ;;  %s611_s5 = inlined_call_operand.hbm [shape: f32[1,16,128], index: 5, kind: output, shape index: {}]  }
   0x1   :  { %11 = vsyncpa [#allocation6], 0 }
   0x2   :  { %12 = vsyncpa [#allocation4], 0  ;;  %s496_s18 = smov [#allocation5]   ;;  %s497_s20 = smov [#allocation2]  }
   0x3   :  { %s33_s19 = sshll.u32 %s496_s18, 4  ;;  %s18_s21 = sshll.u32 %s497_s20, 4  ;;  %s34_s19 = int_to_ptr.vmem [resolvable:$true] %s33_s19  ;;  %s536_s21 = int_to_ptr.vmem [resolvable:$true] %s18_s21 }
   0x4   :  { %s402_s24 = scalar_lea.hbm %s607_s1, 256 }
   0x5   :  { %p403_p0 = scmp.ne.s32.totalorder %s607_s1, %s402_s24  ;;  %p406_p1 = scmp.lt.u32.totalorder %s402_s24, %s607_s1 }
   0x7   :  { %p408_p2 = pnand %p406_p1, %p403_p0 }
   0x9   :  { %411 = shalt.err (!%p408_p2)
}
   0xa   :  { %s412_s29 = scalar_lea.vmem %s34_s19, 256  ;;  %p417_p4 = scmp.lt.s32.totalorder %s34_s19, %s34_s19 }
   0xb   :  { %p413_p3 = scmp.ne.s32.totalorder %s34_s19, %s412_s29  ;;  %p418_p5 = scmp.lt.s32.totalorder %s412_s29, %s412_s29 }
   0xd   :  { %p419_p6 = por %p418_p5, %p417_p4 }
   0xf   :  { %p420_p7 = pnand %p419_p6, %p413_p3 }
  0x11   :  { %423 = shalt.err (!%p420_p7)
}
  0x12   :  { %s498_s30 = smov 64   ;;  %s499_s6 = smov 4  }
  0x13   :  { %39 = dma.hbm_to_vmem [thread:$0]  %s607_s1, 256, %s34_s19, [#allocation6], %s498_s30, %s498_s30, %s499_s6  }
  0x14   :  { %s424_s11 = scalar_lea.hbm %s606_s0, 128 }
  0x15   :  { %p425_p8 = scmp.ne.s32.totalorder %s606_s0, %s424_s11  ;;  %p428_p9 = scmp.lt.u32.totalorder %s424_s11, %s606_s0 }
  0x17   :  { %p430_p10 = pnand %p428_p9, %p425_p8 }
  0x19   :  { %433 = shalt.err (!%p430_p10)
}
  0x1a   :  { %s434_s16 = scalar_lea.vmem %s536_s21, 128  ;;  %p439_p12 = scmp.lt.s32.totalorder %s536_s21, %s536_s21 }
  0x1b   :  { %p435_p11 = scmp.ne.s32.totalorder %s536_s21, %s434_s16  ;;  %p440_p13 = scmp.lt.s32.totalorder %s434_s16, %s434_s16 }
  0x1d   :  { %p441_p0 = por %p440_p13, %p439_p12 }
  0x1f   :  { %p442_p1 = pnand %p441_p0, %p435_p11 }
  0x21   :  { %445 = shalt.err (!%p442_p1)
}
  0x22   :  { %24 = dma.hbm_to_vmem [thread:$0]  %s606_s0, 128, %s536_s21, [#allocation3], %s498_s30, %s498_s30, %s499_s6  }
  0x23   :  { %s500_s18 = smov [#allocation7]   ;;  %s446_s23 = scalar_lea.hbm %s609_s3, 1024 }
  0x24   :  { %s56_s19 = sshll.u32 %s500_s18, 4  ;;  %p447_p2 = scmp.ne.s32.totalorder %s609_s3, %s446_s23  ;;  %s57_s19 = int_to_ptr.vmem [resolvable:$true] %s56_s19 }
  0x25   :  { %p450_p3 = scmp.lt.u32.totalorder %s446_s23, %s609_s3 }
  0x27   :  { %p452_p4 = pnand %p450_p3, %p447_p2 }
  0x29   :  { %455 = shalt.err (!%p452_p4)
}
  0x2a   :  { %s456_s28 = scalar_lea.vmem %s57_s19, 1024  ;;  %p461_p6 = scmp.lt.s32.totalorder %s57_s19, %s57_s19 }
  0x2b   :  { %p457_p5 = scmp.ne.s32.totalorder %s57_s19, %s456_s28  ;;  %p462_p7 = scmp.lt.s32.totalorder %s456_s28, %s456_s28 }
  0x2d   :  { %p463_p8 = por %p462_p7, %p461_p6 }
  0x2f   :  { %p464_p9 = pnand %p463_p8, %p457_p5 }
  0x31   :  { %467 = shalt.err (!%p464_p9)
}
  0x32   :  { %62 = dma.hbm_to_vmem [thread:$0]  %s609_s3, 1024, %s57_s19, [#allocation6], %s498_s30, %s498_s30, %s499_s6  }
  0x33   :  { %490 = dma.done.wait [#allocation3], 128  }
  0x34   :  { %491 = vsyncadd [#allocation3], 4294967168 }
  0x35   :  { %492 = dma.done.wait [#allocation6], 1280  }
  0x36   :  { %493 = vsyncadd [#allocation6], 4294966016  ;;  %v501_v0 = vmov 0.0   ;;  %vm502_vm0 = vmmov 0   ;;  %v387_v1 = vld [vmem:[#allocation5] sm:$0xff]   ;;  %v388_v2 = vld [vmem:[#allocation5 + $0x8] sm:$0xff]  }
  0x37   :  { %349 = vmatprep.subr.bf16.mxu0 %v501_v0  ;;  %353 = vmatprep.mubr.msk.bf16.mxu0 %vm502_vm0, %v501_v0  ;;  %v390_v3 = vld [vmem:[#allocation7] sm:$0xff]   ;;  %v389_v4 = vld [vmem:[#allocation2] sm:$0xff]   ;;  %vm135_vm1 = vcmask 261120   ;;  %v392_v6 = vld [vmem:[#allocation7 + $0x10] sm:$0xff]   ;;  %s503_s6 = smov [#allocation8]  }
  0x38   :  { %357 = vmatprep.subr.bf16.mxu1 %v501_v0  ;;  %373 = vmatprep.mubr.msk.bf16.mxu1 %vm502_vm0, %v501_v0  ;;  %v391_v5 = vld [vmem:[#allocation7 + $0x8] sm:$0xff]   ;;  %v393_v7 = vld [vmem:[#allocation7 + $0x18] sm:$0xff]   ;;  %v394_v8 = vld [vmem:[#allocation7 + $0x20] sm:$0xff]   ;;  %s307_s7 = sshll.u32 %s503_s6, 4  ;;  %s308_s7 = int_to_ptr.vmem [resolvable:$true] %s307_s7 }
  0x39   :  { %350 = vmatpush3.bf16.msra.mxu0 %v387_v1  ;;  %358 = vmatpush3.bf16.msra.mxu1 %v390_v3  ;;  %v395_v9 = vld [vmem:[#allocation7 + $0x28] sm:$0xff]   ;;  %v396_v10 = vld [vmem:[#allocation7 + $0x30] sm:$0xff]   ;;  %v397_v11 = vld [vmem:[#allocation7 + $0x38] sm:$0xff]   ;;  %s468_s8 = scalar_lea.vmem %s308_s7, 256  ;;  %p473_p11 = scmp.lt.s32.totalorder %s308_s7, %s308_s7 }
  0x3a   :  { %351 = vmatprep.subr.bf16.mxu0 %v501_v0  ;;  %359 = vmatprep.subr.bf16.mxu1 %v501_v0  ;;  %v324_v12 = vld [vmem:[%s608_s2] ss:$0 sm:$0xff]  ;;  %p469_p10 = scmp.ne.s32.totalorder %s308_s7, %s468_s8  ;;  %p474_p12 = scmp.lt.s32.totalorder %s468_s8, %s468_s8 }
  0x3b   :  { %v323_v30 = vld [vmem:[%s610_s4] ss:$0 sm:$0xff] }
  0x3c   :  { %p475_p13 = por %p474_p12, %p473_p11 }
  0x3d   :  { %352 = vmatpush3.bf16.msra.mxu0 %v388_v2  ;;  %360 = vmatpush3.bf16.msra.mxu1 %v391_v5 }
  0x3e   :  { %361 = vmatprep.subr.bf16.mxu1 %v501_v0  ;;  %p476_p0 = pnand %p475_p13, %p469_p10 }
  0x40   :  { %354 = vmatmul.mubr.msk.bf16.vlgmr.msra.gmra.mrb[0].mxu0 %vm135_vm1, %v389_v4 }
  0x41   :  { %362 = vmatpush3.bf16.msra.mxu1 %v392_v6 }
  0x42   :  { %363 = vmatprep.subr.bf16.mxu1 %v501_v0 }
  0x45   :  { %364 = vmatpush3.bf16.msra.mxu1 %v393_v7 }
  0x46   :  { %365 = vmatprep.subr.bf16.mxu1 %v501_v0 }
  0x49   :  { %366 = vmatpush3.bf16.msra.mxu1 %v394_v8 }
  0x4a   :  { %367 = vmatprep.subr.bf16.mxu1 %v501_v0 }
  0x4d   :  { %368 = vmatpush3.bf16.msra.mxu1 %v395_v9 }
  0x4e   :  { %369 = vmatprep.subr.bf16.mxu1 %v501_v0 }
  0x51   :  { %370 = vmatpush3.bf16.msra.mxu1 %v396_v10 }
  0x52   :  { %371 = vmatprep.subr.bf16.mxu1 %v501_v0 }
  0x55   :  { %372 = vmatpush3.bf16.msra.mxu1 %v397_v11 }
 0x113   :  { %v173_v13 = vpop.f32.mrb[0].mxu0 }
 0x114   :  { %v174_v14 = vadd.f32 %v324_v12, %v173_v13  ;;  %v355_v15 = vpop.f32.mrb[1].mxu0 }
 0x115   :  { %v176_v16 = vpop.f32.mrb[2].mxu0 }
 0x116   :  { %v182_v17 = vmul.f32 0.70710677, %v174_v14  ;;  %v177_v18 = vadd.f32 %v324_v12, %v176_v16  ;;  %v356_v19 = vpop.f32.mrb[3].mxu0  ;;  %v180_v24 = vmul.f32 0.5, %v174_v14 }
 0x118   :  { %398 = verf.f32 %v182_v17  ;;  %v183_v20 = vmul.f32 0.70710677, %v177_v18  ;;  %v181_v25 = vmul.f32 0.5, %v177_v18 }
 0x11a   :  { %400 = verf.f32 %v183_v20 }
 0x122   :  { %v399_v21 = vpop.eup %398 }
 0x123   :  { %v186_v22 = vadd.f32 1.0, %v399_v21 }
 0x124   :  { %v401_v23 = vpop.eup %400 }
 0x125   :  { %v187_v26 = vadd.f32 1.0, %v401_v23  ;;  %v188_v27 = vmul.f32 %v186_v22, %v180_v24 }
 0x127   :  { %v189_v28 = vmul.f32 %v187_v26, %v181_v25 }
 0x129   :  { %v192_v29 = vpack.c.bf16 %v189_v28, %v188_v27 }
 0x12b   :  { %374 = vmatmul.mubr.bf16.vlgmr.msra.gmra.mrb[0].mxu1 %v192_v29 }
 0x1fe   :  { %v291_v31 = vpop.f32.mrb[0].mxu1 }
 0x1ff   :  { %v298_v32 = vadd.f32 %v323_v30, %v291_v31  ;;  %v375_v33 = vpop.f32.mrb[1].mxu1 }
 0x200   :  { %v294_v34 = vpop.f32.mrb[2].mxu1 }
 0x201   :  { %300 = vst [vmem:[#allocation8] sm:$0xff] %v298_v32  ;;  %v299_v35 = vadd.f32 %v323_v30, %v294_v34  ;;  %v376_v36 = vpop.f32.mrb[3].mxu1 }
 0x203   :  { %301 = vst [vmem:[#allocation8 + $0x8] sm:$0xff] %v299_v35 }
 0x204   :  { %479 = shalt.err (!%p476_p0)
}
 0x205   :  { %s480_s10 = scalar_lea.hbm %s611_s5, 256 }
 0x206   :  { %p481_p1 = scmp.ne.s32.totalorder %s611_s5, %s480_s10  ;;  %p484_p2 = scmp.lt.u32.totalorder %s480_s10, %s611_s5 }
 0x208   :  { %p486_p3 = pnand %p484_p2, %p481_p1 }
 0x20a   :  { %489 = shalt.err (!%p486_p3)
}
 0x20b   :  { %s504_s15 = smov 128   ;;  %s505_s16 = smov 8  }
 0x20c   :  { %313 = dma.vmem_to_hbm [thread:$0]  %s308_s7, 256, %s611_s5, [#allocation4], %s504_s15, %s504_s15, %s505_s16  }
 0x20d   :  { %494 = dma.done.wait [#allocation4], 256  }
 0x20e   :  { %495 = vsyncadd [#allocation4], 4294967040 }
 0x20f   :  { %317 = vsyncpa [#allocation3], 1 }
 0x210   :  { %318 = vsyncpa [#allocation6], 1 }
 0x211   :  { %319 = vsyncpa [#allocation4], 1 }

</bundles_post_ra>
